<compile_context>
chip_gen: v5e
topology: v5e:2x2
jax: 0.10.0
libtpu: 0.0.40
codegen_flags: <defaults>
</compile_context>

<pallas_src>
import jax
import jax.numpy as jnp
from jax import lax
from jax.experimental import pallas as pl
from jax.experimental.pallas import tpu as pltpu


def _pose_loss_kernel(w_ref, p1x_ref, p1q_ref, p2x_ref, p2q_ref, p3x_ref,
                      p3q_ref, gt_ref, out_ref):
    f32 = jnp.float32
    gt = gt_ref[...].astype(f32)                     # (B, 7)
    pose_x = gt[:, 0:3]                              # (B, 3)
    q_raw = gt[:, 3:]                                # (B, 4)

    # Row-wise L2 normalization of the GT quaternion via rsqrt (single EUP op
    # instead of sqrt + divide on the critical path).
    inv_norm = lax.rsqrt(jnp.sum(q_raw * q_raw, axis=1, keepdims=True))  # (B,1)
    pose_q = q_raw * inv_norm                        # (B, 4)

    def sq_fro(d):
        # Squared Frobenius norm, kept 2-D: one lane reduce + one sublane
        # reduce per diff; result stays a (1, 1) vector (no scalar extraction).
        d2 = d * d
        return jnp.sum(jnp.sum(d2, axis=1, keepdims=True), axis=0,
                       keepdims=True)                # (1, 1)

    s1x = sq_fro(pose_x - p1x_ref[...].astype(f32))
    s2x = sq_fro(pose_x - p2x_ref[...].astype(f32))
    s3x = sq_fro(pose_x - p3x_ref[...].astype(f32))
    s1q = sq_fro(pose_q - p1q_ref[...].astype(f32))
    s2q = sq_fro(pose_q - p2q_ref[...].astype(f32))
    s3q = sq_fro(pose_q - p3q_ref[...].astype(f32))

    # Weights live in SMEM: [w1_x, w2_x, w3_x, w1_q, w2_q, w3_q].
    loss = (jnp.sqrt(s1x) * w_ref[0] + jnp.sqrt(s1q) * w_ref[3]
            + jnp.sqrt(s2x) * w_ref[1] + jnp.sqrt(s2q) * w_ref[4]
            + jnp.sqrt(s3x) * w_ref[2] + jnp.sqrt(s3q) * w_ref[5])

    out_ref[...] = loss                              # (1, 1) VMEM


def pose_loss(p1_x, p1_q, p2_x, p2_q, p3_x, p3_q, poseGT,
              *, w1_x, w2_x, w3_x, w1_q, w2_q, w3_q):
    # Runtime-varying weights -> SMEM input (no retrace when values change).
    weights = jnp.asarray([w1_x, w2_x, w3_x, w1_q, w2_q, w3_q],
                          dtype=jnp.float32)

    vmem = pl.BlockSpec(memory_space=pltpu.MemorySpace.VMEM)
    smem = pl.BlockSpec(memory_space=pltpu.MemorySpace.SMEM)

    out = pl.pallas_call(
        _pose_loss_kernel,
        out_shape=jax.ShapeDtypeStruct((1, 1), jnp.float32),
        in_specs=[smem, vmem, vmem, vmem, vmem, vmem, vmem, vmem],
        out_specs=vmem,
    )(weights, p1_x, p1_q, p2_x, p2_q, p3_x, p3_q, poseGT)
    return out[0, 0]


def pose_loss_ref(p1_x, p1_q, p2_x, p2_q, p3_x, p3_q, poseGT,
                  *, w1_x, w2_x, w3_x, w1_q, w2_q, w3_q):
    # Pure-JAX reference mirroring the PyTorch module exactly.
    pose_x = poseGT[:, 0:3]
    pose_q = poseGT[:, 3:]
    pose_q = pose_q / jnp.linalg.norm(pose_q, axis=1, keepdims=True)
    fro = lambda a, b: jnp.sqrt(jnp.sum((a - b) ** 2))
    return (fro(pose_x, p1_x) * w1_x + fro(pose_q, p1_q) * w1_q
            + fro(pose_x, p2_x) * w2_x + fro(pose_q, p2_q) * w2_q
            + fro(pose_x, p3_x) * w3_x + fro(pose_q, p3_q) * w3_q)


if __name__ == "__main__":
    B = 2
    key = jax.random.PRNGKey(0)
    keys = jax.random.split(key, 7)

    p1_x = jax.random.normal(keys[0], (B, 3), dtype=jnp.float32)
    p1_q = jax.random.normal(keys[1], (B, 4), dtype=jnp.float32)
    p2_x = jax.random.normal(keys[2], (B, 3), dtype=jnp.float32)
    p2_q = jax.random.normal(keys[3], (B, 4), dtype=jnp.float32)
    p3_x = jax.random.normal(keys[4], (B, 3), dtype=jnp.float32)
    p3_q = jax.random.normal(keys[5], (B, 4), dtype=jnp.float32)
    poseGT = jax.random.normal(keys[6], (B, 7), dtype=jnp.float32)

    # Deterministic "module init" weights (PoseNet-style auxiliary weighting).
    weights = dict(w1_x=0.3, w2_x=0.3, w3_x=1.0, w1_q=150.0, w2_q=150.0,
                   w3_q=500.0)

    loss = pose_loss(p1_x, p1_q, p2_x, p2_q, p3_x, p3_q, poseGT, **weights)
    loss = jax.block_until_ready(loss)

    ref = pose_loss_ref(p1_x, p1_q, p2_x, p2_q, p3_x, p3_q, poseGT, **weights)
    assert jnp.allclose(loss, ref, rtol=1e-5, atol=1e-5), (loss, ref)

    print("KERNEL_OK")
</pallas_src>

<mosaic_0001>
module attributes {stable_mosaic.version = 11 : i64} {
  func.func @_pose_loss_kernel(%arg0: memref<6xf32, #tpu.memory_space<smem>>, %arg1: memref<2x3xf32, #tpu.memory_space<vmem>>, %arg2: memref<2x4xf32, #tpu.memory_space<vmem>>, %arg3: memref<2x3xf32, #tpu.memory_space<vmem>>, %arg4: memref<2x4xf32, #tpu.memory_space<vmem>>, %arg5: memref<2x3xf32, #tpu.memory_space<vmem>>, %arg6: memref<2x4xf32, #tpu.memory_space<vmem>>, %arg7: memref<2x7xf32, #tpu.memory_space<vmem>>, %arg8: memref<1x1xf32, #tpu.memory_space<vmem>>) attributes {dimension_semantics = [], scalar_prefetch = 0 : i64, scratch_operands = 0 : i64, tpu.core_type = #tpu.core_type<tc>} {
    %c0 = arith.constant 0 : index
    %c0_0 = arith.constant 0 : index
    %0 = vector.load %arg7[%c0, %c0_0] : memref<2x7xf32, #tpu.memory_space<vmem>>, vector<2x7xf32>
    %1 = vector.extract_strided_slice %0 {offsets = [0, 0], sizes = [2, 3], strides = [1, 1]} : vector<2x7xf32> to vector<2x3xf32>
    %2 = vector.extract_strided_slice %0 {offsets = [0, 3], sizes = [2, 4], strides = [1, 1]} : vector<2x7xf32> to vector<2x4xf32>
    %3 = arith.mulf %2, %2 : vector<2x4xf32>
    %cst = arith.constant dense<0.000000e+00> : vector<2xf32>
    %4 = vector.multi_reduction <add>, %3, %cst [1] : vector<2x4xf32> to vector<2xf32>
    %5 = vector.shape_cast %4 : vector<2xf32> to vector<2x1xf32>
    %6 = math.rsqrt %5 : vector<2x1xf32>
    %7 = vector.broadcast %6 : vector<2x1xf32> to vector<2x4xf32>
    %8 = arith.mulf %2, %7 : vector<2x4xf32>
    %c0_1 = arith.constant 0 : index
    %c0_2 = arith.constant 0 : index
    %9 = vector.load %arg1[%c0_1, %c0_2] : memref<2x3xf32, #tpu.memory_space<vmem>>, vector<2x3xf32>
    %10 = arith.subf %1, %9 : vector<2x3xf32>
    %11 = arith.mulf %10, %10 : vector<2x3xf32>
    %cst_3 = arith.constant dense<0.000000e+00> : vector<2xf32>
    %12 = vector.multi_reduction <add>, %11, %cst_3 [1] : vector<2x3xf32> to vector<2xf32>
    %13 = vector.shape_cast %12 : vector<2xf32> to vector<2x1xf32>
    %cst_4 = arith.constant dense<0.000000e+00> : vector<1xf32>
    %14 = vector.multi_reduction <add>, %13, %cst_4 [0] : vector<2x1xf32> to vector<1xf32>
    %15 = vector.shape_cast %14 : vector<1xf32> to vector<1x1xf32>
    %c0_5 = arith.constant 0 : index
    %c0_6 = arith.constant 0 : index
    %16 = vector.load %arg3[%c0_5, %c0_6] : memref<2x3xf32, #tpu.memory_space<vmem>>, vector<2x3xf32>
    %17 = arith.subf %1, %16 : vector<2x3xf32>
    %18 = arith.mulf %17, %17 : vector<2x3xf32>
    %cst_7 = arith.constant dense<0.000000e+00> : vector<2xf32>
    %19 = vector.multi_reduction <add>, %18, %cst_7 [1] : vector<2x3xf32> to vector<2xf32>
    %20 = vector.shape_cast %19 : vector<2xf32> to vector<2x1xf32>
    %cst_8 = arith.constant dense<0.000000e+00> : vector<1xf32>
    %21 = vector.multi_reduction <add>, %20, %cst_8 [0] : vector<2x1xf32> to vector<1xf32>
    %22 = vector.shape_cast %21 : vector<1xf32> to vector<1x1xf32>
    %c0_9 = arith.constant 0 : index
    %c0_10 = arith.constant 0 : index
    %23 = vector.load %arg5[%c0_9, %c0_10] : memref<2x3xf32, #tpu.memory_space<vmem>>, vector<2x3xf32>
    %24 = arith.subf %1, %23 : vector<2x3xf32>
    %25 = arith.mulf %24, %24 : vector<2x3xf32>
    %cst_11 = arith.constant dense<0.000000e+00> : vector<2xf32>
    %26 = vector.multi_reduction <add>, %25, %cst_11 [1] : vector<2x3xf32> to vector<2xf32>
    %27 = vector.shape_cast %26 : vector<2xf32> to vector<2x1xf32>
    %cst_12 = arith.constant dense<0.000000e+00> : vector<1xf32>
    %28 = vector.multi_reduction <add>, %27, %cst_12 [0] : vector<2x1xf32> to vector<1xf32>
    %29 = vector.shape_cast %28 : vector<1xf32> to vector<1x1xf32>
    %c0_13 = arith.constant 0 : index
    %c0_14 = arith.constant 0 : index
    %30 = vector.load %arg2[%c0_13, %c0_14] : memref<2x4xf32, #tpu.memory_space<vmem>>, vector<2x4xf32>
    %31 = arith.subf %8, %30 : vector<2x4xf32>
    %32 = arith.mulf %31, %31 : vector<2x4xf32>
    %cst_15 = arith.constant dense<0.000000e+00> : vector<2xf32>
    %33 = vector.multi_reduction <add>, %32, %cst_15 [1] : vector<2x4xf32> to vector<2xf32>
    %34 = vector.shape_cast %33 : vector<2xf32> to vector<2x1xf32>
    %cst_16 = arith.constant dense<0.000000e+00> : vector<1xf32>
    %35 = vector.multi_reduction <add>, %34, %cst_16 [0] : vector<2x1xf32> to vector<1xf32>
    %36 = vector.shape_cast %35 : vector<1xf32> to vector<1x1xf32>
    %c0_17 = arith.constant 0 : index
    %c0_18 = arith.constant 0 : index
    %37 = vector.load %arg4[%c0_17, %c0_18] : memref<2x4xf32, #tpu.memory_space<vmem>>, vector<2x4xf32>
    %38 = arith.subf %8, %37 : vector<2x4xf32>
    %39 = arith.mulf %38, %38 : vector<2x4xf32>
    %cst_19 = arith.constant dense<0.000000e+00> : vector<2xf32>
    %40 = vector.multi_reduction <add>, %39, %cst_19 [1] : vector<2x4xf32> to vector<2xf32>
    %41 = vector.shape_cast %40 : vector<2xf32> to vector<2x1xf32>
    %cst_20 = arith.constant dense<0.000000e+00> : vector<1xf32>
    %42 = vector.multi_reduction <add>, %41, %cst_20 [0] : vector<2x1xf32> to vector<1xf32>
    %43 = vector.shape_cast %42 : vector<1xf32> to vector<1x1xf32>
    %c0_21 = arith.constant 0 : index
    %c0_22 = arith.constant 0 : index
    %44 = vector.load %arg6[%c0_21, %c0_22] : memref<2x4xf32, #tpu.memory_space<vmem>>, vector<2x4xf32>
    %45 = arith.subf %8, %44 : vector<2x4xf32>
    %46 = arith.mulf %45, %45 : vector<2x4xf32>
    %cst_23 = arith.constant dense<0.000000e+00> : vector<2xf32>
    %47 = vector.multi_reduction <add>, %46, %cst_23 [1] : vector<2x4xf32> to vector<2xf32>
    %48 = vector.shape_cast %47 : vector<2xf32> to vector<2x1xf32>
    %cst_24 = arith.constant dense<0.000000e+00> : vector<1xf32>
    %49 = vector.multi_reduction <add>, %48, %cst_24 [0] : vector<2x1xf32> to vector<1xf32>
    %50 = vector.shape_cast %49 : vector<1xf32> to vector<1x1xf32>
    %51 = math.sqrt %15 : vector<1x1xf32>
    %c0_25 = arith.constant 0 : index
    %52 = memref.load %arg0[%c0_25] : memref<6xf32, #tpu.memory_space<smem>>
    %53 = vector.broadcast %52 : f32 to vector<1x1xf32>
    %54 = arith.mulf %51, %53 : vector<1x1xf32>
    %55 = math.sqrt %36 : vector<1x1xf32>
    %c3 = arith.constant 3 : index
    %56 = memref.load %arg0[%c3] : memref<6xf32, #tpu.memory_space<smem>>
    %57 = vector.broadcast %56 : f32 to vector<1x1xf32>
    %58 = arith.mulf %55, %57 : vector<1x1xf32>
    %59 = arith.addf %54, %58 : vector<1x1xf32>
    %60 = math.sqrt %22 : vector<1x1xf32>
    %c1 = arith.constant 1 : index
    %61 = memref.load %arg0[%c1] : memref<6xf32, #tpu.memory_space<smem>>
    %62 = vector.broadcast %61 : f32 to vector<1x1xf32>
    %63 = arith.mulf %60, %62 : vector<1x1xf32>
    %64 = arith.addf %59, %63 : vector<1x1xf32>
    %65 = math.sqrt %43 : vector<1x1xf32>
    %c4 = arith.constant 4 : index
    %66 = memref.load %arg0[%c4] : memref<6xf32, #tpu.memory_space<smem>>
    %67 = vector.broadcast %66 : f32 to vector<1x1xf32>
    %68 = arith.mulf %65, %67 : vector<1x1xf32>
    %69 = arith.addf %64, %68 : vector<1x1xf32>
    %70 = math.sqrt %29 : vector<1x1xf32>
    %c2 = arith.constant 2 : index
    %71 = memref.load %arg0[%c2] : memref<6xf32, #tpu.memory_space<smem>>
    %72 = vector.broadcast %71 : f32 to vector<1x1xf32>
    %73 = arith.mulf %70, %72 : vector<1x1xf32>
    %74 = arith.addf %69, %73 : vector<1x1xf32>
    %75 = math.sqrt %50 : vector<1x1xf32>
    %c5 = arith.constant 5 : index
    %76 = memref.load %arg0[%c5] : memref<6xf32, #tpu.memory_space<smem>>
    %77 = vector.broadcast %76 : f32 to vector<1x1xf32>
    %78 = arith.mulf %75, %77 : vector<1x1xf32>
    %79 = arith.addf %74, %78 : vector<1x1xf32>
    %c0_26 = arith.constant 0 : index
    %c0_27 = arith.constant 0 : index
    %80 = vector.load %arg8[%c0_26, %c0_27] : memref<1x1xf32, #tpu.memory_space<vmem>>, vector<1x1xf32>
    tpu.vector_store %arg8[%c0_26, %c0_27], %79 {strides = array<i32>} : memref<1x1xf32, #tpu.memory_space<vmem>>, vector<1x1xf32>,
    return
  }
}

</mosaic_0001>

<bundles_post_ra>
// kernel: tpu_custom_call.1
= control target key start
LH: loop header
LB: loop body
LE: loop exit
PB: predicated region body
PF: predicated region fallthrough
CT: control target
= control target key end

     0   :  { %13 = vsyncpa [#allocation5], 0  ;;  %s675_s0 = inlined_call_operand.hbm [shape: f32[6], index: 0, kind: input, shape index: {}]   ;;  %s676_s1 = inlined_call_operand.hbm [shape: f32[2,3], index: 1, kind: input, shape index: {}]   ;;  %s677_s2 = inlined_call_operand.hbm [shape: f32[2,4], index: 2, kind: input, shape index: {}]   ;;  %s678_s3 = inlined_call_operand.vmem [shape: f32[2,3], index: 3, kind: input, shape index: {}]   ;;  %s679_s4 = inlined_call_operand.hbm [shape: f32[2,4], index: 4, kind: input, shape index: {}]   ;;  %s680_s5 = inlined_call_operand.vmem [shape: f32[2,3], index: 5, kind: input, shape index: {}]   ;;  %s681_s6 = inlined_call_operand.hbm [shape: f32[2,4], index: 6, kind: input, shape index: {}]   ;;  %s682_s7 = inlined_call_operand.vmem [shape: f32[2,7], index: 7, kind: input, shape index: {}]   ;;  %s683_s8 = inlined_call_operand.hbm [shape: f32[1,1], index: 8, kind: output, shape index: {}]  }
   0x1   :  { %14 = vsyncpa [#allocation3], 0 }
   0x2   :  { %15 = vsyncpa [#allocation8], 0 }
   0x3   :  { %16 = vsyncpa [#allocation11], 0  ;;  %s43_s29 = sshll.u32 %s677_s2, 4  ;;  %s44_s29 = int_to_ptr.hbm [resolvable:$true] %s43_s29 }
   0x4   :  { %17 = vsyncpa [#allocation4], 0  ;;  %s509_s30 = smov [#allocation7]   ;;  %s23_s12 = sshll.u32 %s675_s0, 4  ;;  %s24_s12 = int_to_ptr.hbm [resolvable:$true] %s23_s12 }
   0x5   :  { %s45_s9 = sshll.u32 %s509_s30, 4  ;;  %s510_s13 = smov [#allocation2]   ;;  %s46_s9 = int_to_ptr.vmem [resolvable:$true] %s45_s9 }
   0x6   :  { %48 = dma.hbm_to_vmem [thread:$0]  %s44_s29, 32, %s46_s9, [#allocation8]  }
   0x7   :  { %26 = dma.hbm_to_smem %s24_s12, 16, %s510_s13, [#allocation5]  }
   0x8   :  { %s32_s16 = sshll.u32 %s676_s1, 4  ;;  %s511_s17 = smov [#allocation6]   ;;  %s33_s16 = int_to_ptr.hbm [resolvable:$true] %s32_s16 }
   0x9   :  { %s34_s2 = sshll.u32 %s511_s17, 4  ;;  %s56_s20 = sshll.u32 %s679_s4, 4  ;;  %s35_s2 = int_to_ptr.vmem [resolvable:$true] %s34_s2  ;;  %s57_s20 = int_to_ptr.hbm [resolvable:$true] %s56_s20 }
   0xa   :  { %37 = dma.hbm_to_vmem [thread:$0]  %s33_s16, 32, %s35_s2, [#allocation3]  }
   0xb   :  { %s512_s21 = smov [#allocation9]   ;;  %s69_s24 = sshll.u32 %s681_s6, 4  ;;  %s70_s24 = int_to_ptr.hbm [resolvable:$true] %s69_s24 }
   0xc   :  { %s58_s0 = sshll.u32 %s512_s21, 4  ;;  %s513_s1 = smov [#allocation10]   ;;  %s59_s0 = int_to_ptr.vmem [resolvable:$true] %s58_s0 }
   0xd   :  { %61 = dma.hbm_to_vmem [thread:$0]  %s57_s20, 32, %s59_s0, [#allocation8]  }
   0xe   :  { %s71_s25 = sshll.u32 %s513_s1, 4  ;;  %s72_s25 = int_to_ptr.vmem [resolvable:$true] %s71_s25 }
   0xf   :  { %74 = dma.hbm_to_vmem [thread:$0]  %s70_s24, 32, %s72_s25, [#allocation11]  }
  0x10   :  { %499 = dma.done.wait [#allocation5], 16  }
  0x11   :  { %500 = vsyncadd [#allocation5], 4294967280 }
  0x12   :  { %501 = dma.done.wait [#allocation3], 32  }
  0x13   :  { %502 = vsyncadd [#allocation3], 4294967264 }
  0x14   :  { %503 = dma.done.wait [#allocation8], 64  }
  0x15   :  { %504 = vsyncadd [#allocation8], 4294967232 }
  0x16   :  { %505 = dma.done.wait [#allocation11], 32  }
  0x17   :  { %506 = vsyncadd [#allocation11], 4294967264 }
  0x18   :  { %97 = sfence }
  0x19   :  { %v98_v0 = vld [vmem:[%s682_s7] sm:$0x3]  ;;  %s514_s6 = smov 125   ;;  %v160_v2 = vld [vmem:[#allocation7] sm:$0x3]  ;;  %s515_s27 = smov 3  }
  0x1a   :  { %v99_v1 = vmul.f32 %v98_v0, %v98_v0  ;;  %v202_v3 = vld [vmem:[#allocation10] sm:$0x3]  ;;  %162 = vrot.lane.b32.xlu1 %v160_v2, %s515_s27  ;;  %v181_v4 = vld [vmem:[#allocation9] sm:$0x3]  ;;  %vm104_vm0 = vcmask 25600   ;;  %vm122_vm1 = vcmask 17408  }
  0x1b   :  { %204 = vrot.lane.b32.xlu2 %v202_v3, %s515_s27  ;;  %v134_v8 = vld [vmem:[%s678_s3] sm:$0x3]  ;;  %vm126_vm5 = vcmask 1041408   ;;  %s625_s30 = sld [smem:[#allocation2 + $0x3]]  ;;  %s516_s13 = smov [#allocation12]  }
  0x1c   :  { %101 = vrot.lane.b32.xlu0 %v99_v1, %s514_s6  ;;  %v135_v9 = vsub.f32 %v98_v0, %v134_v8  ;;  %v119_v29 = vld [vmem:[#allocation6] sm:$0x3]  ;;  %s638_s9 = sld [smem:[#allocation2 + $0x1]]  ;;  %s325_s14 = sshll.u32 %s516_s13, 4  ;;  %s326_s14 = int_to_ptr.vmem [resolvable:$true] %s325_s14 }
  0x1d   :  { %v120_v30 = vsub.f32 %v98_v0, %v119_v29  ;;  %v147_v33 = vld [vmem:[%s680_s5] sm:$0x3]  ;;  %s622_s5 = sld [smem:[#allocation2]]  ;;  %s327_s17 = sshll.u32 %s683_s8, 4  ;;  %s328_s17 = int_to_ptr.hbm [resolvable:$true] %s327_s17 }
  0x1e   :  { %v136_v10 = vmul.f32 %v135_v9, %v135_v9  ;;  %v148_v34 = vsub.f32 %v98_v0, %v147_v33  ;;  %s642_s10 = sld [smem:[#allocation2 + $0x4]] }
  0x1f   :  { %v121_v31 = vmul.f32 %v120_v30, %v120_v30  ;;  %s652_s11 = sld [smem:[#allocation2 + $0x2]] }
  0x20   :  { %v137_v11 = vsel %vm122_vm1, %v136_v10, 0.0  ;;  %v149_v37 = vmul.f32 %v148_v34, %v148_v34  ;;  %s344_s12 = sld [smem:[#allocation2 + $0x5]] }
  0x21   :  { %v123_v32 = vsel %vm122_vm1, %v121_v31, 0.0 }
  0x22   :  { %183 = vrot.lane.b32.xlu1 %v181_v4, %s515_s27  ;;  %v150_v38 = vsel %vm122_vm1, %v149_v37, 0.0 }
  0x75   :  { %v205_v26 = vpop.permute.xlu2 %204 }
  0x8c   :  { %v163_v14 = vpop.permute.xlu1 %162 }
  0x8e   :  { %v102_v5 = vpop.permute.xlu0 %101 }
  0x8f   :  { %v105_v6 = vsel %vm104_vm0, %v102_v5, 0.0 }
  0x90   :  { %106 = vadd.xlane.f32.xlu0 %v105_v6 }
  0x94   :  { %v184_v20 = vpop.permute.xlu1 %183 }
  0x98   :  { %138 = vadd.xlane.f32.xlu0 %v137_v11 }
 0x103   :  { %v107_v7 = vpop.xlane.xlu0 %106 }
 0x104   :  { %353 = vrsqrt.f32 %v107_v7  ;;  %vm114_vm3 = vweird.f32 %v107_v7 }
 0x10a   :  { %v354_v12 = vpop.eup %353 }
 0x10b   :  { %v109_v13 = vmul.f32 %v354_v12, %v107_v7  ;;  %vm115_vm2 = vweird.f32 %v354_v12  ;;  %v139_v45 = vpop.xlane.xlu0 %138 }
 0x10c   :  { %vm116_vm4 = vmor %vm114_vm3, %vm115_vm2  ;;  %v140_v47 = vsel %vm126_vm5, %v139_v45, 0.0  ;;  %vm318_vm2 = vcmask 0  }
 0x10d   :  { %v110_v15 = vmul.f32 %v354_v12, %v109_v13  ;;  %v141_v49 = vrot.slane %v140_v47, 4 }
 0x10f   :  { %v111_v16 = vmul.f32 0.5, %v110_v15  ;;  %v142_v51 = vadd.f32 %v141_v49, %v140_v47 }
 0x111   :  { %v112_v17 = vsub.f32 1.5, %v111_v16  ;;  %v143_v56 = vrot.slane %v142_v51, 2 }
 0x113   :  { %v113_v18 = vmul.f32 %v354_v12, %v112_v17  ;;  %v144_v60 = vadd.f32 %v143_v56, %v142_v51 }
 0x115   :  { %v117_v19 = vsel %vm116_vm4, %v354_v12, %v113_v18  ;;  %v145_v3 = vrot.slane %v144_v60, 1 }
 0x116   :  { %v118_v21 = vmul.f32 %v117_v19, %v98_v0 }
 0x117   :  { %v607_v7 = vadd.f32 %v145_v3, %v144_v60 }
 0x118   :  { %v165_v22 = vsub.f32 %v118_v21, %v163_v14  ;;  %v186_v23 = vsub.f32 %v118_v21, %v184_v20  ;;  %v207_v27 = vsub.f32 %v118_v21, %v205_v26 }
 0x119   :  { %vm261_vm10 = vcmp.eq.f32.partialorder %v607_v7, inf  ;;  %vm263_vm11 = vcmp.eq.f32.partialorder %v607_v7, 0.0 }
 0x11a   :  { %v166_v24 = vmul.f32 %v165_v22, %v165_v22  ;;  %v187_v25 = vmul.f32 %v186_v23, %v186_v23  ;;  %v208_v28 = vmul.f32 %v207_v27, %v207_v27 }
 0x11c   :  { %189 = vrot.lane.b32.xlu1 %v187_v25, %s514_s6  ;;  %168 = vrot.lane.b32.xlu2 %v166_v24, %s514_s6 }
 0x124   :  { %210 = vrot.lane.b32.xlu2 %v208_v28, %s514_s6 }
 0x146   :  { %124 = vadd.xlane.f32.xlu1 %v123_v32 }
 0x176   :  { %v169_v35 = vpop.permute.xlu2 %168 }
 0x177   :  { %v171_v36 = vsel %vm104_vm0, %v169_v35, 0.0 }
 0x178   :  { %172 = vadd.xlane.f32.xlu2 %v171_v36 }
 0x17e   :  { %v211_v41 = vpop.permute.xlu2 %210 }
 0x17f   :  { %v213_v42 = vsel %vm104_vm0, %v211_v41, 0.0 }
 0x180   :  { %151 = vadd.xlane.f32.xlu2 %v150_v38 }
 0x18e   :  { %v190_v39 = vpop.permute.xlu1 %189 }
 0x18f   :  { %v192_v40 = vsel %vm104_vm0, %v190_v39, 0.0 }
 0x190   :  { %193 = vadd.xlane.f32.xlu0 %v192_v40 }
 0x198   :  { %214 = vadd.xlane.f32.xlu0 %v213_v42 }
 0x1b9   :  { %v125_v43 = vpop.xlane.xlu1 %124 }
 0x1ba   :  { %v127_v44 = vsel %vm126_vm5, %v125_v43, 0.0 }
 0x1bb   :  { %v128_v46 = vrot.slane %v127_v44, 4 }
 0x1bd   :  { %v129_v48 = vadd.f32 %v128_v46, %v127_v44 }
 0x1bf   :  { %v130_v50 = vrot.slane %v129_v48, 2 }
 0x1c1   :  { %v131_v53 = vadd.f32 %v130_v50, %v129_v48 }
 0x1c3   :  { %v132_v58 = vrot.slane %v131_v53, 1 }
 0x1c5   :  { %v600_v63 = vadd.f32 %v132_v58, %v131_v53 }
 0x1c7   :  { %355 = vrsqrt.f32 %v600_v63  ;;  %vm230_vm6 = vcmp.eq.f32.partialorder %v600_v63, inf  ;;  %vm232_vm8 = vcmp.eq.f32.partialorder %v600_v63, 0.0 }
 0x1cd   :  { %v356_v10 = vpop.eup %355 }
 0x1ce   :  { %v224_v13 = vmul.f32 %v356_v10, %v600_v63 }
 0x1d0   :  { %v225_v19 = vmul.f32 %v356_v10, %v224_v13 }
 0x1d2   :  { %v226_v24 = vmul.f32 0.5, %v225_v19 }
 0x1d4   :  { %v227_v33 = vsub.f32 1.5, %v226_v24 }
 0x1d6   :  { %v228_v40 = vmul.f32 %v356_v10, %v227_v33 }
 0x1d8   :  { %v229_v46 = vmul.f32 %v228_v40, %v600_v63 }
 0x1da   :  { %v231_v53 = vsel %vm230_vm6, %v600_v63, %v229_v46 }
 0x1eb   :  { %v173_v52 = vpop.xlane.xlu2 %172 }
 0x1ec   :  { %v174_v54 = vsel %vm126_vm5, %v173_v52, 0.0 }
 0x1ed   :  { %v175_v55 = vrot.slane %v174_v54, 4 }
 0x1ef   :  { %v176_v57 = vadd.f32 %v175_v55, %v174_v54  ;;  %v233_v54 = vand.u32 2147483648, %v600_v63 }
 0x1f1   :  { %v177_v59 = vrot.slane %v176_v57, 2 }
 0x1f3   :  { %v178_v61 = vadd.f32 %v177_v59, %v176_v57  ;;  %v152_v62 = vpop.xlane.xlu2 %151 }
 0x1f4   :  { %v153_v0 = vsel %vm126_vm5, %v152_v62, 0.0  ;;  %v236_v62 = vstv %s622_s5 }
 0x1f5   :  { %v179_v1 = vrot.slane %v178_v61, 1  ;;  %v154_v2 = vrot.slane %v153_v0, 4 }
 0x1f7   :  { %v603_v4 = vadd.f32 %v179_v1, %v178_v61  ;;  %v155_v5 = vadd.f32 %v154_v2, %v153_v0  ;;  %v234_v61 = vsel %vm232_vm8, %v233_v54, %v231_v53  ;;  %v251_v0 = vstv %s625_s30 }
 0x1f8   :  { %v264_v1 = vand.u32 2147483648, %v607_v7 }
 0x1f9   :  { %357 = vrsqrt.f32 %v603_v4  ;;  %v156_v6 = vrot.slane %v155_v5, 2  ;;  %vm245_vm7 = vcmp.eq.f32.partialorder %v603_v4, inf  ;;  %v248_v58 = vand.u32 2147483648, %v603_v4 }
 0x1fa   :  { %359 = vrsqrt.f32 %v607_v7  ;;  %vm247_vm9 = vcmp.eq.f32.partialorder %v603_v4, 0.0 }
 0x1fb   :  { %v157_v8 = vadd.f32 %v156_v6, %v155_v5 }
 0x1fd   :  { %v158_v9 = vrot.slane %v157_v8, 1 }
 0x1ff   :  { %v358_v11 = vpop.eup %357  ;;  %v610_v12 = vadd.f32 %v158_v9, %v157_v8  ;;  %v237_v8 = vmul.f32 %v236_v62, %v234_v61 }
 0x200   :  { %v239_v14 = vmul.f32 %v358_v11, %v603_v4  ;;  %v360_v16 = vpop.eup %359 }
 0x201   :  { %361 = vrsqrt.f32 %v610_v12  ;;  %v255_v22 = vmul.f32 %v360_v16, %v607_v7  ;;  %vm293_vm14 = vcmp.eq.f32.partialorder %v610_v12, inf  ;;  %vm295_vm15 = vcmp.eq.f32.partialorder %v610_v12, 0.0 }
 0x202   :  { %v240_v20 = vmul.f32 %v358_v11, %v239_v14 }
 0x203   :  { %v194_v15 = vpop.xlane.xlu0 %193  ;;  %v256_v29 = vmul.f32 %v360_v16, %v255_v22 }
 0x204   :  { %v195_v17 = vsel %vm126_vm5, %v194_v15, 0.0  ;;  %v241_v25 = vmul.f32 0.5, %v240_v20 }
 0x205   :  { %v196_v18 = vrot.slane %v195_v17, 4  ;;  %v257_v38 = vmul.f32 0.5, %v256_v29 }
 0x206   :  { %v242_v34 = vsub.f32 1.5, %v241_v25 }
 0x207   :  { %v197_v21 = vadd.f32 %v196_v18, %v195_v17  ;;  %v362_v26 = vpop.eup %361  ;;  %v258_v44 = vsub.f32 1.5, %v257_v38  ;;  %v283_v18 = vstv %s642_s10 }
 0x208   :  { %v287_v35 = vmul.f32 %v362_v26, %v610_v12  ;;  %v243_v41 = vmul.f32 %v358_v11, %v242_v34  ;;  %v315_v34 = vstv %s344_s12 }
 0x209   :  { %v198_v23 = vrot.slane %v197_v21, 2  ;;  %v259_v51 = vmul.f32 %v360_v16, %v258_v44  ;;  %v267_v16 = vstv %s638_s9 }
 0x20a   :  { %v288_v42 = vmul.f32 %v362_v26, %v287_v35  ;;  %v244_v47 = vmul.f32 %v243_v41, %v603_v4 }
 0x20b   :  { %v199_v27 = vadd.f32 %v198_v23, %v197_v21  ;;  %v215_v28 = vpop.xlane.xlu0 %214  ;;  %v260_v59 = vmul.f32 %v259_v51, %v607_v7 }
 0x20c   :  { %v216_v30 = vsel %vm126_vm5, %v215_v28, 0.0  ;;  %v289_v48 = vmul.f32 0.5, %v288_v42  ;;  %v246_v55 = vsel %vm245_vm7, %v603_v4, %v244_v47 }
 0x20d   :  { %v200_v31 = vrot.slane %v199_v27, 1  ;;  %v217_v32 = vrot.slane %v216_v30, 4  ;;  %v249_v63 = vsel %vm247_vm9, %v248_v58, %v246_v55  ;;  %v262_v6 = vsel %vm261_vm10, %v607_v7, %v260_v59 }
 0x20e   :  { %v290_v57 = vsub.f32 1.5, %v289_v48  ;;  %v252_v4 = vmul.f32 %v251_v0, %v249_v63  ;;  %v265_v11 = vsel %vm263_vm11, %v264_v1, %v262_v6 }
 0x20f   :  { %v619_v36 = vadd.f32 %v200_v31, %v199_v27  ;;  %v218_v37 = vadd.f32 %v217_v32, %v216_v30  ;;  %v268_v22 = vmul.f32 %v267_v16, %v265_v11  ;;  %v299_v30 = vstv %s652_s11 }
 0x210   :  { %v291_v3 = vmul.f32 %v362_v26, %v290_v57  ;;  %v253_v7 = vadd.f32 %v252_v4, %v237_v8  ;;  %v296_v26 = vand.u32 2147483648, %v610_v12 }
 0x211   :  { %363 = vrsqrt.f32 %v619_v36  ;;  %v219_v39 = vrot.slane %v218_v37, 2  ;;  %vm277_vm12 = vcmp.eq.f32.partialorder %v619_v36, inf  ;;  %v280_v17 = vand.u32 2147483648, %v619_v36 }
 0x212   :  { %v292_v14 = vmul.f32 %v291_v3, %v610_v12  ;;  %vm279_vm13 = vcmp.eq.f32.partialorder %v619_v36, 0.0  ;;  %v269_v27 = vadd.f32 %v268_v22, %v253_v7 }
 0x213   :  { %v220_v43 = vadd.f32 %v219_v39, %v218_v37 }
 0x214   :  { %v294_v24 = vsel %vm293_vm14, %v610_v12, %v292_v14 }
 0x215   :  { %v221_v45 = vrot.slane %v220_v43, 1  ;;  %v297_v29 = vsel %vm295_vm15, %v296_v26, %v294_v24 }
 0x216   :  { %v300_v35 = vmul.f32 %v299_v30, %v297_v29 }
 0x217   :  { %v364_v49 = vpop.eup %363  ;;  %v629_v50 = vadd.f32 %v221_v45, %v220_v43 }
 0x218   :  { %v271_v52 = vmul.f32 %v364_v49, %v619_v36 }
 0x219   :  { %365 = vrsqrt.f32 %v629_v50  ;;  %vm309_vm0 = vcmp.eq.f32.partialorder %v629_v50, inf  ;;  %v312_v33 = vand.u32 2147483648, %v629_v50  ;;  %vm311_vm1 = vcmp.eq.f32.partialorder %v629_v50, 0.0 }
 0x21a   :  { %v272_v56 = vmul.f32 %v364_v49, %v271_v52 }
 0x21c   :  { %v273_v60 = vmul.f32 0.5, %v272_v56 }
 0x21e   :  { %v274_v2 = vsub.f32 1.5, %v273_v60 }
 0x21f   :  { %v366_v5 = vpop.eup %365 }
 0x220   :  { %v275_v9 = vmul.f32 %v364_v49, %v274_v2  ;;  %v303_v10 = vmul.f32 %v366_v5, %v629_v50 }
 0x222   :  { %v276_v13 = vmul.f32 %v275_v9, %v619_v36  ;;  %v304_v15 = vmul.f32 %v366_v5, %v303_v10 }
 0x224   :  { %v278_v19 = vsel %vm277_vm12, %v619_v36, %v276_v13  ;;  %v305_v20 = vmul.f32 0.5, %v304_v15 }
 0x225   :  { %v281_v21 = vsel %vm279_vm13, %v280_v17, %v278_v19 }
 0x226   :  { %v284_v23 = vmul.f32 %v283_v18, %v281_v21  ;;  %v306_v25 = vsub.f32 1.5, %v305_v20 }
 0x228   :  { %v307_v28 = vmul.f32 %v366_v5, %v306_v25  ;;  %v285_v31 = vadd.f32 %v284_v23, %v269_v27 }
 0x22a   :  { %v308_v32 = vmul.f32 %v307_v28, %v629_v50  ;;  %v301_v12 = vadd.f32 %v300_v35, %v285_v31 }
 0x22c   :  { %v310_v36 = vsel %vm309_vm0, %v629_v50, %v308_v32 }
 0x22d   :  { %v313_v37 = vsel %vm311_vm1, %v312_v33, %v310_v36 }
 0x22e   :  { %v316_v38 = vmul.f32 %v315_v34, %v313_v37 }
 0x230   :  { %v317_v39 = vadd.f32 %v316_v38, %v301_v12 }
 0x232   :  { %319 = vst.msk [vmem:[#allocation12] sm:$0x1] %vm318_vm2, %v317_v39 }
 0x233   :  { %330 = dma.vmem_to_hbm [thread:$0]  %s326_s14, 16, %s328_s17, [#allocation4]  }
 0x234   :  { %507 = dma.done.wait [#allocation4], 16  }
 0x235   :  { %508 = vsyncadd [#allocation4], 4294967280 }
 0x236   :  { %335 = vsyncpa [#allocation3], 1 }
 0x237   :  { %336 = vsyncpa [#allocation8], 1 }
 0x238   :  { %337 = vsyncpa [#allocation11], 1 }
 0x239   :  { %338 = vsyncpa [#allocation4], 1 }
 0x23a   :  { %339 = vsyncpa [#allocation5], 1 }

</bundles_post_ra>
